<compile_context>
chip_gen: v7x
topology: tpu7x:2x2x1
jax: 0.10.0
libtpu: 0.0.40
codegen_flags: <defaults>
</compile_context>

<pallas_src>
import jax
import jax.numpy as jnp
from jax.experimental import pallas as pl
from jax.experimental.pallas import tpu as pltpu


def swiglu_ffn_kernel(x_ref, wgv_ref, w2_ref, out_ref, *scratch):
    # x_ref:   (TM, E)          activations, already in the weight dtype
    # wgv_ref: (E, 2*TH)        fused [gate | value] weight slab
    # w2_ref:  (TH, E)          down-projection slab
    # out_ref: (TM, E)          resident across the H (k) axis
    # scratch: optional (TM, E) f32 accumulator (only when out dtype != f32)
    acc_ref = scratch[0] if scratch else out_ref
    k = pl.program_id(1)
    th = wgv_ref.shape[1] // 2          # static

    @pl.when(k == 0)
    def _():
        acc_ref[...] = jnp.zeros_like(acc_ref)

    # One wide MXU pass for gate+value; f32 results.
    gv = jnp.dot(x_ref[...], wgv_ref[...], preferred_element_type=jnp.float32)
    g = gv[:, :th]
    v = gv[:, th:]
    h = jax.nn.silu(g) * v              # SwiGLU hidden, f32

    # Partial down-projection; f32 accumulation across H slabs.
    acc_ref[...] += jnp.dot(h.astype(w2_ref.dtype), w2_ref[...],
                            preferred_element_type=jnp.float32)

    if scratch:
        @pl.when(k == pl.num_programs(1) - 1)
        def _():
            out_ref[...] = acc_ref[...].astype(out_ref.dtype)


def _round_up(x, m):
    return ((x + m - 1) // m) * m


def _vmem_capacity_bytes():
    try:
        return int(pltpu.get_tpu_info().vmem_capacity_bytes)
    except Exception:
        # Conservative default (v7x per-TC VMEM).
        return 64 * 1024 * 1024


def _select_tiles(M, H, tile_m, tile_h, vmem_cap):
    if tile_m is None:
        # 128 MiB VMEM (v5e/v6e) -> big M tiles to amortize weight streaming;
        # 64 MiB per-TC (v7x) -> cap at 512 (HBM crossover is already reached).
        tile_m = 1024 if vmem_cap >= (100 << 20) else 512
    if tile_h is None:
        tile_h = 512                    # 256-aligned for the 2x256x256 MXU
    tile_h = max(128, _round_up(tile_h, 128))
    th = min(tile_h, _round_up(H, 128))
    tm = M if M <= tile_m else _round_up(tile_m, 8)
    return tm, th


def feed_forward_swiglu(x, w_w, w_v, w_w2, *, tile_m=None, tile_h=None):
    """x: (B, T, E) -> (B, T, E).  w_w/w_v: (E, H), w_w2: (H, E) (pre-transposed)."""
    B, T, E = x.shape
    H = w_w.shape[1]
    assert w_w.shape == (E, H) and w_v.shape == (E, H) and w_w2.shape == (H, E)
    M = B * T

    vmem_cap = _vmem_capacity_bytes()
    tm, th = _select_tiles(M, H, tile_m, tile_h, vmem_cap)
    n_k = pl.cdiv(H, th)
    H_pad = n_k * th

    # --- Weight packing (do once at load time in production; cheap vs the
    #     matmuls for M >= tm here).  Zero-padding H makes every slab full:
    #     silu(0)*0 = 0 and the padded W2 rows are zero, so padded columns
    #     contribute exactly nothing -> no in-kernel masking, no OOB reads.
    pad = H_pad - H
    w_g = jnp.pad(w_w, ((0, 0), (0, pad))) if pad else w_w
    w_u = jnp.pad(w_v, ((0, 0), (0, pad))) if pad else w_v
    w2p = jnp.pad(w_w2, ((0, pad), (0, 0))) if pad else w_w2
    w_gv = jnp.concatenate(
        [w_g.reshape(E, n_k, th), w_u.reshape(E, n_k, th)], axis=-1
    ).reshape(E, 2 * H_pad)

    # Cast activations to the weight dtype once (bf16 MXU path, half the DMA).
    x2 = x.reshape(M, E).astype(w_gv.dtype)

    out_dtype = x.dtype
    # f32 output -> accumulate straight into the resident output block.
    use_acc_scratch = out_dtype != jnp.float32
    scratch_shapes = [pltpu.VMEM((tm, E), jnp.float32)] if use_acc_scratch else []

    grid = (pl.cdiv(M, tm), n_k)

    x_itm = jnp.dtype(x2.dtype).itemsize
    w_itm = jnp.dtype(w_gv.dtype).itemsize
    o_itm = jnp.dtype(out_dtype).itemsize

    # Weights are re-streamed once per M tile; x is resident across k.
    weight_bytes = grid[0] * (w_gv.size + w2p.size) * w_itm
    cost = pl.CostEstimate(
        flops=6 * M * E * H,            # three M*E*H matmuls
        transcendentals=M * H,          # sigmoid in SiLU
        bytes_accessed=int(M * E * x_itm + weight_bytes + M * E * o_itm),
    )

    # Tile footprint: double-buffered BlockSpec tiles + resident accumulator.
    footprint = (2 * tm * E * x_itm              # x
                 + 2 * E * 2 * th * w_itm        # fused gate/value slab
                 + 2 * th * E * w_itm            # W2 slab
                 + 2 * tm * E * o_itm            # out
                 + (tm * E * 4 if use_acc_scratch else 0))
    vmem_limit = int(min(vmem_cap - (4 << 20),
                         max(32 << 20, footprint + (16 << 20))))

    # TODO(synk): for v7x decode (single M tile), add an E-parallel grid axis
    # over W2 columns / out columns so both TensorCores get work, and consider
    # pipeline_mode=pl.Buffered(3) on the weight BlockSpecs.
    out2 = pl.pallas_call(
        swiglu_ffn_kernel,
        out_shape=jax.ShapeDtypeStruct((M, E), out_dtype),
        grid_spec=pltpu.PrefetchScalarGridSpec(
            num_scalar_prefetch=0,
            grid=grid,
            in_specs=[
                pl.BlockSpec((tm, E), lambda i, k: (i, 0)),      # x tile (resident over k)
                pl.BlockSpec((E, 2 * th), lambda i, k: (0, k)),  # fused [gate|value] slab
                pl.BlockSpec((th, E), lambda i, k: (k, 0)),      # W2 slab
            ],
            out_specs=pl.BlockSpec((tm, E), lambda i, k: (i, 0)),
            scratch_shapes=scratch_shapes,
        ),
        compiler_params=pltpu.CompilerParams(
            dimension_semantics=("parallel", "arbitrary"),
            vmem_limit_bytes=vmem_limit,
        ),
        cost_estimate=cost,
    )(x2, w_gv, w2p)

    return out2.reshape(B, T, E)


def reference_swiglu(x, w_w, w_v, w_w2):
    g = jnp.dot(x, w_w)
    v = jnp.dot(x, w_v)
    return jnp.dot(jax.nn.silu(g) * v, w_w2)


if __name__ == "__main__":
    # Config: EMBED=96, FF_EXP=4  ->  hidden_dim = int(2 * 384 / 3) = 256
    # (multiple_of = 1, ffn_dim_multiplier = None, exactly as in the module).
    B, T, EMBED, FF_EXP = 2, 8, 96, 4
    multiple_of = 1
    H = int(2 * (EMBED * FF_EXP) / 3)
    H = multiple_of * ((H + multiple_of - 1) // multiple_of)

    key = jax.random.PRNGKey(0)
    kx, kw, kv, k2 = jax.random.split(key, 4)

    x = jax.random.normal(kx, (B, T, EMBED), dtype=jnp.float32)
    # Deterministic scaled-normal init (akin to nn.Linear default scale),
    # stored pre-transposed: (in_features, out_features).
    w_w = jax.random.normal(kw, (EMBED, H), dtype=jnp.float32) * (1.0 / EMBED ** 0.5)
    w_v = jax.random.normal(kv, (EMBED, H), dtype=jnp.float32) * (1.0 / EMBED ** 0.5)
    w_w2 = jax.random.normal(k2, (H, EMBED), dtype=jnp.float32) * (1.0 / H ** 0.5)

    # tile_h=128 exercises a 2-step H reduction (H=256) plus the fused-slab
    # packing at this small config; production shapes use the per-generation
    # defaults (tile_h=512, tile_m 512/1024).  E=96 < 128 here means masked
    # output stores; production E that is a multiple of 128 gets lane-dense
    # stores with no code change.
    out = feed_forward_swiglu(x, w_w, w_v, w_w2, tile_h=128)
    out = jax.block_until_ready(out)

    ref = reference_swiglu(x, w_w, w_v, w_w2)
    assert out.shape == (B, T, EMBED)
    assert jnp.allclose(out, ref, atol=1e-4, rtol=1e-4), "mismatch vs reference"

    print("KERNEL_OK")
</pallas_src>

<mosaic_0001>
module attributes {stable_mosaic.version = 11 : i64} {
  func.func @swiglu_ffn_kernel(%arg0: i32, %arg1: i32, %arg2: memref<16x96xf32, #tpu.memory_space<vmem>>, %arg3: memref<96x256xf32, #tpu.memory_space<vmem>>, %arg4: memref<128x96xf32, #tpu.memory_space<vmem>>, %arg5: memref<16x96xf32, #tpu.memory_space<vmem>>) attributes {dimension_semantics = [#tpu.dimension_semantics<parallel>, #tpu.dimension_semantics<arbitrary>], iteration_bounds = array<i64: 1, 2>, scalar_prefetch = 0 : i64, scratch_operands = 0 : i64, tpu.core_type = #tpu.core_type<tc>, window_params = [{transform_indices = @transform_0, window_bounds = array<i64: 16, 96>}, {transform_indices = @transform_1, window_bounds = array<i64: 96, 256>}, {transform_indices = @transform_2, window_bounds = array<i64: 128, 96>}, {transform_indices = @transform_3, window_bounds = array<i64: 16, 96>}]} {
    %c0_i32 = arith.constant 0 : i32
    %0 = arith.cmpi eq, %arg1, %c0_i32 : i32
    %1 = arith.extui %0 : i1 to i32
    %c0_i32_0 = arith.constant 0 : i32
    %2 = arith.cmpi ne, %1, %c0_i32_0 : i32
    scf.if %2 {
      %cst_12 = arith.constant 0.000000e+00 : f32
      %20 = vector.broadcast %cst_12 : f32 to vector<16x96xf32>
      %c0_13 = arith.constant 0 : index
      %c0_14 = arith.constant 0 : index
      %21 = vector.load %arg5[%c0_13, %c0_14] : memref<16x96xf32, #tpu.memory_space<vmem>>, vector<16x96xf32>
      tpu.vector_store %arg5[%c0_13, %c0_14], %20 {strides = array<i32>} : memref<16x96xf32, #tpu.memory_space<vmem>>, vector<16x96xf32>,
    } else {
    }
    %c0 = arith.constant 0 : index
    %c0_1 = arith.constant 0 : index
    %3 = vector.load %arg2[%c0, %c0_1] : memref<16x96xf32, #tpu.memory_space<vmem>>, vector<16x96xf32>
    %c0_2 = arith.constant 0 : index
    %c0_3 = arith.constant 0 : index
    %4 = vector.load %arg3[%c0_2, %c0_3] : memref<96x256xf32, #tpu.memory_space<vmem>>, vector<96x256xf32>
    %cst = arith.constant dense<0.000000e+00> : vector<16x256xf32>
    %5 = tpu.matmul %3, %4, %cst {dimension_numbers = #tpu.dot_dimension_numbers<[1], [0], [0], [1], [0, 0, 1, 1], [], []>} : vector<16x96xf32>, vector<96x256xf32>, vector<16x256xf32> -> vector<16x256xf32>
    %6 = vector.extract_strided_slice %5 {offsets = [0, 0], sizes = [16, 128], strides = [1, 1]} : vector<16x256xf32> to vector<16x128xf32>
    %7 = vector.extract_strided_slice %5 {offsets = [0, 128], sizes = [16, 128], strides = [1, 1]} : vector<16x256xf32> to vector<16x128xf32>
    %8 = arith.negf %6 : vector<16x128xf32>
    %9 = math.exp %8 : vector<16x128xf32>
    %cst_4 = arith.constant 1.000000e+00 : f32
    %10 = vector.broadcast %cst_4 : f32 to vector<16x128xf32>
    %11 = arith.addf %10, %9 : vector<16x128xf32>
    %12 = arith.divf %10, %11 : vector<16x128xf32>
    %13 = arith.mulf %6, %12 : vector<16x128xf32>
    %14 = arith.mulf %13, %7 : vector<16x128xf32>
    %c0_5 = arith.constant 0 : index
    %c0_6 = arith.constant 0 : index
    %15 = vector.load %arg5[%c0_5, %c0_6] : memref<16x96xf32, #tpu.memory_space<vmem>>, vector<16x96xf32>
    %c0_7 = arith.constant 0 : index
    %c0_8 = arith.constant 0 : index
    %16 = vector.load %arg4[%c0_7, %c0_8] : memref<128x96xf32, #tpu.memory_space<vmem>>, vector<128x96xf32>
    %cst_9 = arith.constant dense<0.000000e+00> : vector<16x96xf32>
    %17 = tpu.matmul %14, %16, %cst_9 {dimension_numbers = #tpu.dot_dimension_numbers<[1], [0], [0], [1], [0, 0, 1, 1], [], []>} : vector<16x128xf32>, vector<128x96xf32>, vector<16x96xf32> -> vector<16x96xf32>
    %18 = arith.addf %15, %17 : vector<16x96xf32>
    %c0_10 = arith.constant 0 : index
    %c0_11 = arith.constant 0 : index
    %19 = vector.load %arg5[%c0_10, %c0_11] : memref<16x96xf32, #tpu.memory_space<vmem>>, vector<16x96xf32>
    tpu.vector_store %arg5[%c0_10, %c0_11], %18 {strides = array<i32>} : memref<16x96xf32, #tpu.memory_space<vmem>>, vector<16x96xf32>,
    return
  }
  func.func @transform_0(%arg0: i32, %arg1: i32) -> (i32, i32) {
    %c0_i32 = arith.constant 0 : i32
    %c0_i32_0 = arith.constant 0 : i32
    return %arg0, %c0_i32 : i32, i32
  }
  func.func @transform_1(%arg0: i32, %arg1: i32) -> (i32, i32) {
    %c0_i32 = arith.constant 0 : i32
    %c0_i32_0 = arith.constant 0 : i32
    return %c0_i32, %arg1 : i32, i32
  }
  func.func @transform_2(%arg0: i32, %arg1: i32) -> (i32, i32) {
    %c0_i32 = arith.constant 0 : i32
    %c0_i32_0 = arith.constant 0 : i32
    return %arg1, %c0_i32 : i32, i32
  }
  func.func @transform_3(%arg0: i32, %arg1: i32) -> (i32, i32) {
    %c0_i32 = arith.constant 0 : i32
    %c0_i32_0 = arith.constant 0 : i32
    return %arg0, %c0_i32 : i32, i32
  }
}

</mosaic_0001>

<bundles_post_ra>
// kernel: tpu_custom_call.1
= control target key start
LH: loop header
LB: loop body
LE: loop exit
PB: predicated region body
PF: predicated region fallthrough
CT: control target
= control target key end

     0   :  { %8 = vsyncpa [#allocation4], 0  ;;  %s895_s12 = smov 0   ;;  %s897_s13 = smov 0   ;;  %s1096_s0 = inlined_call_operand.vmem [shape: f32[16,96], index: 0, kind: input, shape index: {}]   ;;  %s1097_s1 = inlined_call_operand.vmem [shape: f32[96,512], index: 1, kind: input, shape index: {}]   ;;  %s1098_s2 = inlined_call_operand.vmem [shape: f32[256,96], index: 2, kind: input, shape index: {}]   ;;  %s1099_s3 = inlined_call_operand.hbm [shape: f32[16,96], index: 3, kind: output, shape index: {}]  }
   0x1   :  { %s899_s14 = smov 0   ;;  %s901_s15 = smov 0  }
   0x2   :  { %s903_s16 = smov 0  }
   0x3 LB: > { %s611_s17 = sadd.s32 4294967295, %s868_s16   ;;  %s23_s18 = sadd.s32 1, %s864_s15  ;;  %s868_s16 = sphi %s903_s16, %s14_s16   ;;  %s864_s15 = sphi %s901_s15, %s1104_s15   ;;  %s860_s14 = sphi %s899_s14, %s1103_s14   ;;  %s856_s13 = sphi %s897_s13, %s1102_s13   ;;  %s852_s12 = sphi %s895_s12, %s1101_s12  }
   0x4   : > { %p24_p0 = scmp.ge.s32.totalorder %s23_s18, 2  ;;  %p66_p1 = scmp.ne.s32.totalorder %s856_s13, %s852_s12 }
   0x5   : > { %p67_p2 = scmp.eq.s32.totalorder %s868_s16, 0  ;;  %s59_s20 = sadd.s32 1, %s856_s13 }
   0x6   : > { %s1106_s18 = smov (%p24_p0, %s23_s18), 0  ;;  %p614_p5 = scmp.ge.s32.totalorder %s868_s16, 2 }
   0x7   : > { %p68_p3 = por %p67_p2, %p66_p1  ;;  %s56_s19 = ssub.s32 %s864_s15, %s1106_s18 }
   0x8   : > { %p57_p4 = scmp.eq.s32.totalorder %s56_s19, 0  ;;  %153 = sbr.rel (%p614_p5) target bundleno = 31 (0x1f), region = 20 }
   0xa   : > { %s931_s21 = scalar_select %p57_p4, %s856_s13, %s59_s20  }
   0xf   : > { %156 = sbr.rel (!%p68_p3) target bundleno = 31 (0x1f), region = 24  ;;  %s158_s22 = sand.u32 (%p68_p3), 1, %s856_s13  }
  0x10   : > { %s629_s23 = sshll.u32 (%p68_p3), %s864_s15, 4  ;;  %s739_s24 = smul.u32 (%p68_p3), 192, %s158_s22 }
  0x11   : > { %s939_s27 = scalar_lea.vmem (%p68_p3), %s1097_s1, %s629_s23 }
  0x12   : > { %v176_v0 = vld [vmem:[%s939_s27] sm:$0xff] (%p68_p3)  ;;  %v178_v1 = vld [vmem:[%s939_s27 + $0x8] sm:$0xff] (%p68_p3)  ;;  %s947_s28 = scalar_lea.vmem (%p68_p3), [#allocation2], %s739_s24 }
  0x13   : > { %v180_v2 = vld [vmem:[%s939_s27 + $0x20] sm:$0xff] (%p68_p3)  ;;  %v182_v3 = vld [vmem:[%s939_s27 + $0x28] sm:$0xff] (%p68_p3)  ;;  %177 = vst [vmem:[%s947_s28] sm:$0xff] (%p68_p3), %v176_v0  ;;  %179 = vst [vmem:[%s947_s28 + $0x8] sm:$0xff] (%p68_p3), %v178_v1 }
  0x14   : > { %v184_v4 = vld [vmem:[%s939_s27 + $0x40] sm:$0xff] (%p68_p3)  ;;  %v186_v5 = vld [vmem:[%s939_s27 + $0x48] sm:$0xff] (%p68_p3)  ;;  %181 = vst [vmem:[%s947_s28 + $0x10] sm:$0xff] (%p68_p3), %v180_v2  ;;  %183 = vst [vmem:[%s947_s28 + $0x18] sm:$0xff] (%p68_p3), %v182_v3 }
  0x15   : > { %185 = vst [vmem:[%s947_s28 + $0x20] sm:$0xff] (%p68_p3), %v184_v4  ;;  %187 = vst [vmem:[%s947_s28 + $0x28] sm:$0xff] (%p68_p3), %v186_v5  ;;  %v188_v6 = vld [vmem:[%s939_s27 + $0x60] sm:$0xff] (%p68_p3)  ;;  %v190_v7 = vld [vmem:[%s939_s27 + $0x68] sm:$0xff] (%p68_p3) }
  0x16   : > { %v192_v8 = vld [vmem:[%s939_s27 + $0x80] sm:$0xff]  ;;  %189 = vst [vmem:[%s947_s28 + $0x30] sm:$0xff] %v188_v6  ;;  %191 = vst [vmem:[%s947_s28 + $0x38] sm:$0xff] %v190_v7  ;;  %v194_v9 = vld [vmem:[%s939_s27 + $0x88] sm:$0xff] }
  0x17   : > { %193 = vst [vmem:[%s947_s28 + $0x40] sm:$0xff] %v192_v8  ;;  %v196_v10 = vld [vmem:[%s939_s27 + $0xa0] sm:$0xff]  ;;  %v198_v11 = vld [vmem:[%s939_s27 + $0xa8] sm:$0xff]  ;;  %195 = vst [vmem:[%s947_s28 + $0x48] sm:$0xff] %v194_v9 }
  0x18   : > { %197 = vst [vmem:[%s947_s28 + $0x50] sm:$0xff] %v196_v10  ;;  %199 = vst [vmem:[%s947_s28 + $0x58] sm:$0xff] %v198_v11  ;;  %v200_v12 = vld [vmem:[%s939_s27 + $0xc0] sm:$0xff]  ;;  %v202_v13 = vld [vmem:[%s939_s27 + $0xc8] sm:$0xff] }
  0x19   : > { %v204_v14 = vld [vmem:[%s939_s27 + $0xe0] sm:$0xff]  ;;  %201 = vst [vmem:[%s947_s28 + $0x60] sm:$0xff] %v200_v12  ;;  %203 = vst [vmem:[%s947_s28 + $0x68] sm:$0xff] %v202_v13  ;;  %v206_v15 = vld [vmem:[%s939_s27 + $0xe8] sm:$0xff] }
  0x1a   : > { %205 = vst [vmem:[%s947_s28 + $0x70] sm:$0xff] %v204_v14  ;;  %v208_v16 = vld [vmem:[%s939_s27 + $0x100] sm:$0xff]  ;;  %v210_v17 = vld [vmem:[%s939_s27 + $0x108] sm:$0xff]  ;;  %207 = vst [vmem:[%s947_s28 + $0x78] sm:$0xff] %v206_v15 }
  0x1b   : > { %209 = vst [vmem:[%s947_s28 + $0x80] sm:$0xff] %v208_v16  ;;  %211 = vst [vmem:[%s947_s28 + $0x88] sm:$0xff] %v210_v17  ;;  %v212_v18 = vld [vmem:[%s939_s27 + $0x120] sm:$0xff]  ;;  %v214_v19 = vld [vmem:[%s939_s27 + $0x128] sm:$0xff] }
  0x1c   : > { %v216_v20 = vld [vmem:[%s939_s27 + $0x140] sm:$0xff]  ;;  %213 = vst [vmem:[%s947_s28 + $0x90] sm:$0xff] %v212_v18  ;;  %215 = vst [vmem:[%s947_s28 + $0x98] sm:$0xff] %v214_v19  ;;  %v218_v21 = vld [vmem:[%s939_s27 + $0x148] sm:$0xff] }
  0x1d   : > { %217 = vst [vmem:[%s947_s28 + $0xa0] sm:$0xff] %v216_v20  ;;  %v220_v22 = vld [vmem:[%s939_s27 + $0x160] sm:$0xff]  ;;  %v222_v23 = vld [vmem:[%s939_s27 + $0x168] sm:$0xff]  ;;  %219 = vst [vmem:[%s947_s28 + $0xa8] sm:$0xff] %v218_v21 }
  0x1e   : > { %221 = vst [vmem:[%s947_s28 + $0xb0] sm:$0xff] %v220_v22  ;;  %223 = vst [vmem:[%s947_s28 + $0xb8] sm:$0xff] %v222_v23 }
  0x1f PF: > { %p617_p6 = scmp.ge.s32.totalorder %s868_s16, 1  ;;  %p237_p7 = scmp.lt.s32.totalorder %s868_s16, 3 }
  0x21   : > { %p238_p8 = pnand %p617_p6, %p237_p7 }
  0x22   : > { %s244_s29 = sand.u32 (!%p238_p8), 1, %s852_s12   ;;  %s618_s30 = sshll.u32 (!%p238_p8), %s860_s14, 4 }
  0x23   : > { %241 = sbr.rel (%p238_p8) target bundleno = 553 (0x229), region = 51  ;;  %p280_p9 = scmp.lt.s32.totalorder (!%p238_p8), %s618_s30, 31 }
  0x24   : > { %s740_s4 = smul.u32 (!%p238_p8), 192, %s244_s29  ;;  %p620_p10 = scmp.ne.s32.totalorder (!%p238_p8), %s860_s14, 0 }
  0x26   : > { %s1000_s9 = scalar_lea.vmem (!%p238_p8), [#allocation2], %s740_s4 }
  0x2a   : > { %s1108_s30 = smov (!%p280_p9, %s618_s30), 31  ;;  %289 = sbr.rel (%p620_p10) target bundleno = 49 (0x31), region = 59 }
  0x2b   : > { %s619_s5 = sshll.u32 %s1108_s30, 3  ;;  %vm290_vm0 = vcmask (!%p620_p10), 785408   ;;  %v870_v24 = vmov (!%p620_p10), 0.0  }
  0x2c   : > { %s998_s8 = scalar_lea.vmem %s1098_s2, %s619_s5  ;;  %291 = vst.msk [vmem:[#allocation3] sm:$0xff] (!%p620_p10), %vm290_vm0, %v870_v24  ;;  %292 = vst.msk [vmem:[#allocation3 + $0x8] sm:$0xff] (!%p620_p10), %vm290_vm0, %v870_v24 }
  0x31 PF: > { %v296_v25 = vld [vmem:[%s1000_s9 + $0x8] sm:$0xff]  ;;  %v298_v26 = vld [vmem:[%s1000_s9 + $0x18] sm:$0xff]  ;;  %v295_v27 = vld [vmem:[%s1000_s9] sm:$0xff]  ;;  %v871_v32 = vmov 0.0   ;;  %vm319_vm1 = vcmask 785408   ;;  %s872_s19 = smov [#allocation3]  }
  0x32   : > { %v683_v28 = vpack.c.bf16 %v298_v26, %v296_v25  ;;  %v297_v29 = vld [vmem:[%s1000_s9 + $0x10] sm:$0xff]  ;;  %v300_v30 = vld [vmem:[%s1000_s9 + $0x28] sm:$0xff]  ;;  %v302_v31 = vld [vmem:[%s1000_s9 + $0x38] sm:$0xff]  ;;  %390 = vmatprep.mubr.f32.mxu0 %v871_v32  ;;  %s525_s20 = sshll.u32 %s872_s19, 4  ;;  %p1053_p11 = scmp.eq.s32.totalorder %s611_s17, 1  ;;  %s526_s20 = int_to_ptr.vmem [resolvable:$true] %s525_s20 }
  0x33   : > { %v685_v33 = vpack.c.bf16 %v297_v29, %v295_v27  ;;  %v687_v34 = vpack.c.bf16 %v302_v31, %v300_v30  ;;  %v299_v35 = vld [vmem:[%s1000_s9 + $0x20] sm:$0xff]  ;;  %v301_v36 = vld [vmem:[%s1000_s9 + $0x30] sm:$0xff]  ;;  %v304_v37 = vld [vmem:[%s1000_s9 + $0x48] sm:$0xff]  ;;  %s800_s23 = scalar_lea.vmem %s526_s20, 256  ;;  %p807_p1 = scmp.lt.s32.totalorder %s526_s20, %s526_s20 }
  0x34   : > { %684 = vmatprep.subr.bf16.mxu0 %v683_v28  ;;  %v306_v38 = vld [vmem:[%s1000_s9 + $0x58] sm:$0xff]  ;;  %v689_v39 = vpack.c.bf16 %v301_v36, %v299_v35  ;;  %v303_v41 = vld [vmem:[%s1000_s9 + $0x40] sm:$0xff]  ;;  %v305_v42 = vld [vmem:[%s1000_s9 + $0x50] sm:$0xff]  ;;  %p801_p12 = scmp.ne.s32.totalorder %s526_s20, %s800_s23  ;;  %p808_p2 = scmp.lt.s32.totalorder %s800_s23, %s800_s23 }
  0x35   : > { %686 = vmatpush1.bf16.msra.mxu0 %v685_v33  ;;  %v691_v40 = vpack.c.bf16 %v306_v38, %v304_v37  ;;  %v308_v43 = vld [vmem:[%s1000_s9 + $0x68] sm:$0xff]  ;;  %v310_v44 = vld [vmem:[%s1000_s9 + $0x78] sm:$0xff]  ;;  %v693_v45 = vpack.c.bf16 %v305_v42, %v303_v41  ;;  %v307_v47 = vld [vmem:[%s1000_s9 + $0x60] sm:$0xff] }
  0x36   : > { %688 = vmatprep.subr.bf16.mxu0 %v687_v34  ;;  %v695_v46 = vpack.c.bf16 %v310_v44, %v308_v43  ;;  %v309_v48 = vld [vmem:[%s1000_s9 + $0x70] sm:$0xff]  ;;  %v312_v49 = vld [vmem:[%s1000_s9 + $0x88] sm:$0xff]  ;;  %v314_v50 = vld [vmem:[%s1000_s9 + $0x98] sm:$0xff]  ;;  %p802_p13 = pnand %p801_p12, %p1053_p11  ;;  %p809_p3 = por %p808_p2, %p807_p1 }
  0x37   : > { %v697_v51 = vpack.c.bf16 %v309_v48, %v307_v47  ;;  %v699_v52 = vpack.c.bf16 %v314_v50, %v312_v49  ;;  %v311_v53 = vld [vmem:[%s1000_s9 + $0x80] sm:$0xff]  ;;  %v313_v54 = vld [vmem:[%s1000_s9 + $0x90] sm:$0xff]  ;;  %v316_v55 = vld [vmem:[%s1000_s9 + $0xa8] sm:$0xff] }
  0x38   : > { %v318_v56 = vld [vmem:[%s1000_s9 + $0xb8] sm:$0xff]  ;;  %v701_v57 = vpack.c.bf16 %v313_v54, %v311_v53  ;;  %v315_v59 = vld [vmem:[%s1000_s9 + $0xa0] sm:$0xff]  ;;  %v317_v60 = vld [vmem:[%s1000_s9 + $0xb0] sm:$0xff]  ;;  %p803_p0 = pneg %p802_p13 }
  0x39   : > { %690 = vmatpush1.bf16.msra.mxu0 %v689_v39  ;;  %v703_v58 = vpack.c.bf16 %v318_v56, %v316_v55  ;;  %v705_v61 = vpack.c.bf16 %v317_v60, %v315_v59  ;;  %v293_v62 = vld [vmem:[%s1096_s0] sm:$0xff]  ;;  %v294_v63 = vld [vmem:[%s1096_s0 + $0x8] sm:$0xff]  ;;  %v423_v3 = vld [vmem:[%s998_s8 + $0x10] sm:$0xff] }
  0x3a   : > { %692 = vmatprep.subr.bf16.mxu0 %v691_v40  ;;  %v421_v0 = vld [vmem:[%s998_s8] sm:$0xff]  ;;  %v422_v1 = vld [vmem:[%s998_s8 + $0x8] sm:$0xff]  ;;  %v424_v4 = vld [vmem:[%s998_s8 + $0x18] sm:$0xff]  ;;  %p810_p4 = pnand %p809_p3, %p803_p0 }
  0x3b   : > { %v707_v2 = vpack.c.bf16 %v422_v1, %v421_v0  ;;  %v711_v5 = vpack.c.bf16 %v424_v4, %v423_v3  ;;  %v425_v6 = vld [vmem:[%s998_s8 + $0x20] sm:$0xff]  ;;  %v426_v7 = vld [vmem:[%s998_s8 + $0x28] sm:$0xff]  ;;  %v427_v9 = vld [vmem:[%s998_s8 + $0x30] sm:$0xff] }
  0x3c   : > { %v715_v8 = vpack.c.bf16 %v426_v7, %v425_v6  ;;  %v428_v10 = vld [vmem:[%s998_s8 + $0x38] sm:$0xff]  ;;  %v429_v12 = vld [vmem:[%s998_s8 + $0x40] sm:$0xff]  ;;  %v430_v13 = vld [vmem:[%s998_s8 + $0x48] sm:$0xff] }
  0x3d   : > { %694 = vmatpush1.bf16.msra.mxu0 %v693_v45  ;;  %708 = vmatprep.subr.bf16.mxu1 %v707_v2  ;;  %v719_v11 = vpack.c.bf16 %v428_v10, %v427_v9  ;;  %v723_v14 = vpack.c.bf16 %v430_v13, %v429_v12  ;;  %v431_v15 = vld [vmem:[%s998_s8 + $0x50] sm:$0xff]  ;;  %v432_v16 = vld [vmem:[%s998_s8 + $0x58] sm:$0xff]  ;;  %v433_v18 = vld [vmem:[%s998_s8 + $0x60] sm:$0xff] }
  0x3e   : > { %696 = vmatprep.subr.bf16.mxu0 %v695_v46  ;;  %710 = vmatpush3.bf16.msra.mxu1 %v707_v2  ;;  %v727_v17 = vpack.c.bf16 %v432_v16, %v431_v15  ;;  %v434_v19 = vld [vmem:[%s998_s8 + $0x68] sm:$0xff]  ;;  %v435_v21 = vld [vmem:[%s998_s8 + $0x70] sm:$0xff]  ;;  %v436_v22 = vld [vmem:[%s998_s8 + $0x78] sm:$0xff] }
  0x3f   : > { %712 = vmatprep.subr.bf16.mxu1 %v711_v5  ;;  %v731_v20 = vpack.c.bf16 %v434_v19, %v433_v18  ;;  %v735_v23 = vpack.c.bf16 %v436_v22, %v435_v21  ;;  %v420_v40 = vld [vmem:[#allocation3 + $0x8] sm:$0xff]  ;;  %v419_v41 = vld [vmem:[#allocation3] sm:$0xff] }
  0x41   : > { %698 = vmatpush1.bf16.msra.mxu0 %v697_v51 }
  0x42   : > { %700 = vmatprep.subr.bf16.mxu0 %v699_v52  ;;  %714 = vmatpush3.bf16.msra.mxu1 %v711_v5 }
  0x43   : > { %716 = vmatprep.subr.bf16.mxu1 %v715_v8 }
  0x45   : > { %702 = vmatpush1.bf16.msra.mxu0 %v701_v57 }
  0x46   : > { %704 = vmatprep.subr.bf16.mxu0 %v703_v58  ;;  %718 = vmatpush3.bf16.msra.mxu1 %v715_v8 }
  0x47   : > { %720 = vmatprep.subr.bf16.mxu1 %v719_v11 }
  0x49   : > { %706 = vmatpush1.bf16.msra.mxu0 %v705_v61 }
  0x4a   : > { %722 = vmatpush3.bf16.msra.mxu1 %v719_v11 }
  0x4b   : > { %724 = vmatprep.subr.bf16.mxu1 %v723_v14 }
  0x4c   : > { %621 = vmatmul.mubr.msk.f32.vlgmr.msra.gmra.mrb[0].mxu0 %vm319_vm1, %v293_v62 }
  0x4d   : > { %396 = vmatprep.mubr.f32.mxu0 %v871_v32 }
  0x4e   : > { %726 = vmatpush3.bf16.msra.mxu1 %v723_v14 }
  0x4f   : > { %728 = vmatprep.subr.bf16.mxu1 %v727_v17 }
  0x50   : > { %622 = vmatmul.mubr.msk.f32.gmra.mrb[2].mxu0 %vm319_vm1, %v294_v63 }
  0x52   : > { %730 = vmatpush3.bf16.msra.mxu1 %v727_v17 }
  0x53   : > { %732 = vmatprep.subr.bf16.mxu1 %v731_v20 }
  0x56   : > { %734 = vmatpush3.bf16.msra.mxu1 %v731_v20 }
  0x57   : > { %736 = vmatprep.subr.bf16.mxu1 %v735_v23 }
  0x5a   : > { %738 = vmatpush3.bf16.msra.mxu1 %v735_v23 }
 0x11f   : > { %v392_v24 = vpop.f32.mrb[0].mxu0 }
 0x120   : > { %v623_v25 = vmul.f32 -1.442695, %v392_v24  ;;  %v394_v26 = vpop.f32.mrb[1].mxu0 }
 0x122   : > { %792 = vpow2.f32 %v623_v25 }
 0x123   : > { %v398_v27 = vpop.f32.mrb[2].mxu0 }
 0x124   : > { %v624_v28 = vmul.f32 -1.442695, %v398_v27  ;;  %v400_v29 = vpop.f32.mrb[3].mxu0 }
 0x126   : > { %794 = vpow2.f32 %v624_v28 }
 0x12c   : > { %v793_v30 = vpop.eup %792 }
 0x12d   : > { %v409_v31 = vadd.f32 1.0, %v793_v30 }
 0x12f   : > { %796 = vrcp.f32 %v409_v31 }
 0x130   : > { %v795_v32 = vpop.eup %794 }
 0x131   : > { %v410_v33 = vadd.f32 1.0, %v795_v32 }
 0x133   : > { %798 = vrcp.f32 %v410_v33 }
 0x139   : > { %v797_v34 = vpop.eup %796 }
 0x13a   : > { %v415_v35 = vmul.f32 %v797_v34, %v392_v24 }
 0x13c   : > { %v417_v36 = vmul.f32 %v415_v35, %v394_v26 }
 0x13d   : > { %v799_v37 = vpop.eup %798 }
 0x13e   : > { %v416_v38 = vmul.f32 %v799_v37, %v398_v27  ;;  %680 = vmatprep.mubr.f32.mxu1 %v417_v36 }
 0x140   : > { %v418_v39 = vmul.f32 %v416_v38, %v400_v29 }
 0x142   : > { %681 = vmatmul.mubr.f32.vlgmr.msra.gmra.mrb[0].mxu1 %v418_v39 }
 0x215   : > { %v682_v42 = vpop.f32.mrb[0].mxu1 }
 0x216   : > { %v513_v43 = vadd.f32 %v682_v42, %v420_v40  ;;  %v503_v44 = vpop.f32.mrb[1].mxu1 }
 0x217   : > { %v512_v45 = vadd.f32 %v503_v44, %v419_v41 }
 0x218   : > { %515 = vst.msk [vmem:[#allocation3 + $0x8] sm:$0xff] %vm319_vm1, %v513_v43 }
 0x219   : > { %514 = vst.msk [vmem:[#allocation3] sm:$0xff] %vm319_vm1, %v512_v45 }
 0x21a   : > { %813 = shalt.err (!%p810_p4)
}
 0x21b   : > { %s814_s25 = scalar_lea.hbm %s1099_s3, 256 }
 0x21c   : > { %p815_p5 = scmp.ne.s32.totalorder %s1099_s3, %s814_s25  ;;  %p820_p8 = scmp.lt.u32.totalorder %s814_s25, %s1099_s3 }
 0x21e   : > { %p816_p6 = pnand %p815_p5, %p1053_p11 }
 0x220   : > { %p817_p7 = pneg %p816_p6 }
 0x222   : > { %p822_p9 = pnand %p820_p8, %p817_p7 }
 0x224   : > { %825 = shalt.err (!%p822_p9)
}
 0x225   : > { %s873_s30 = smov 128   ;;  %s874_s4 = smov 8  }
 0x226   : > { %742 = dma.vmem_to_hbm [thread:$0]  (%p1053_p11), %s526_s20, 256, %s1099_s3, [#allocation4], %s873_s30, %s873_s30, %s874_s4  }
 0x227   : > { %847 = dma.done.wait (%p1053_p11), [#allocation4], 256  }
 0x228   : > { %849 = vsyncadd (%p1053_p11), [#allocation4], 4294967040 }
 0x229 PF: > { %s14_s16 = sadd.s32 1, %s868_s16   ;;  %s1101_s12 = smov %s856_s13 }
 0x22a   : > { %p11_p10 = scmp.ge.s32.totalorder %s14_s16, 4   ;;  %s1102_s13 = smov %s931_s21 }
 0x22b   : > { %s1103_s14 = smov %s864_s15  ;;  %s1104_s15 = smov %s1106_s18 }
 0x22c   :  { %13 = sbr.rel (!%p11_p10) target bundleno = 3 (0x3), region = 98 }
 0x233   :  { %541 = vsyncpa [#allocation4], 1 }
 0x234   :  { %543 = vsyncpa [#allocation4 + $0x1], 1 }

</bundles_post_ra>
